<compile_context>
chip_gen: v7x
topology: tpu7x:2x2x1
jax: 0.10.0
libtpu: 0.0.40
codegen_flags: <defaults>
</compile_context>

<pallas_src>
import functools

import jax
import jax.numpy as jnp
from jax.experimental import pallas as pl
from jax.experimental.pallas import tpu as pltpu


def _reachability_kernel(obs_ref, mem_ref,
                         w1a_ref, w1b_ref, b1_ref,
                         w2_ref, b2_ref, wdiff_ref, bdiff_ref,
                         memmask_ref, envmask_ref,
                         out_ref,
                         *, a, b, tile_envs, mem_slots, compute_dtype):
    TE, M = tile_envs, mem_slots
    H = w2_ref.shape[1]
    cdt = compute_dtype

    # ---- layer 1: relu([obs ; mem] @ [w1a ; w1b] + b1).  The concat is never
    #      materialised: the obs branch is computed once per env at (TE, H) (b1 folded
    #      in) and broadcast over that env's M memory slots (leading-dim reshape +
    #      sublane broadcast, no selection matmul).  Inputs are cast to bf16 in-kernel
    #      right before the MXU; accumulation / epilogue stay f32. ----
    h_obs = jnp.dot(obs_ref[...].astype(cdt), w1a_ref[...],
                    preferred_element_type=jnp.float32) + b1_ref[...]        # (TE, H)
    h_mem = jnp.dot(mem_ref[...].astype(cdt), w1b_ref[...],
                    preferred_element_type=jnp.float32)                      # (TE*M, H)
    h1 = jnp.maximum(h_mem.reshape(TE, M, H) + h_obs[:, None, :], 0.0)       # (TE, M, H)

    # ---- layer 2 (bf16 MXU operands, f32 accumulate + epilogue) ----
    h2 = jnp.maximum(
        jnp.dot(h1.reshape(TE * M, H).astype(cdt), w2_ref[...],
                preferred_element_type=jnp.float32) + b2_ref[...], 0.0)      # (TE*M, H)

    # ---- head: softmax(r_net(...), dim=1)[:, 1] == sigmoid(h2 @ (w3[:,1]-w3[:,0]) + bd)
    #      VPU multiply + lane reduce instead of a lane-width-2 MXU matmul; sigmoid is
    #      applied ONCE per env after the masked max (monotone).  Per-slot validity is
    #      rebuilt in-kernel from memory_mask (no extra (R,1) input). ----
    score = jnp.sum(h2.reshape(TE, M, H) * wdiff_ref[...], axis=-1)          # (TE, M)
    slot_id = jax.lax.broadcasted_iota(jnp.int32, (TE, M), 1)
    valid = slot_id < memmask_ref[...]                                       # (TE, M)
    masked = jnp.where(valid, score, jnp.float32(-1e30))                     # finite sentinel
    max_v = jnp.max(masked, axis=1, keepdims=True)                           # (TE, 1)

    sim = jax.nn.sigmoid(max_v + bdiff_ref[0, 0])
    # envs with empty memory keep the torch.ones(...) initial similarity of 1.0
    sim = jnp.where(memmask_ref[...] > 0, sim, jnp.float32(1.0))
    ir = a * (b - sim) * envmask_ref[...]
    out_ref[...] = jnp.concatenate([ir, sim], axis=-1)                       # (TE, 2)


def reachability_act(obs_features, memory, memory_mask, masks, params, *, a, b,
                     compute_dtype=jnp.bfloat16, core_parallel=False):
    """ReachabilityPolicy.act intrinsic-reward math ('max' aggregation).

    Returns (intrinsic_reward [E, 1], similarities [E])."""
    E, F = obs_features.shape
    _, M, _ = memory.shape
    H = params["w2"].shape[0]
    assert M % 8 == 0 and F % 128 == 0 and H % 128 == 0

    # ---- row-tile selection: big tiles amortize the ~0.35us/step grid overhead.
    #      tile_envs is a multiple of 8 whenever the env axis is actually tiled and E is
    #      padded up (masked tail) instead of a divisor search. ----
    TARGET_ROWS = 1024            # 512-1024 already fills v5e's MXU; good for v6e/v7x too
    if E * M <= TARGET_ROWS:
        tile_envs = E
    else:
        tile_envs = max(8, ((TARGET_ROWS // M) // 8) * 8)
    E_pad = ((E + tile_envs - 1) // tile_envs) * tile_envs
    grid = (E_pad // tile_envs,)
    rows_per_tile = tile_envs * M

    if E_pad != E:
        # TODO(synk): for production, keep num_envs a multiple of the env tile (or
        # pre-pad the persistent memory buffer) so this pad never copies `memory`.
        pe = E_pad - E
        obs_features = jnp.pad(obs_features, ((0, pe), (0, 0)))
        memory = jnp.pad(memory, ((0, pe), (0, 0), (0, 0)))
        memory_mask = jnp.pad(memory_mask, ((0, pe),))
        masks = jnp.pad(masks, ((0, pe),))

    # ---- wrapper-side prep: layout plumbing only (no dtype cast of memory/obs). ----
    mem_flat = memory.reshape(E_pad * M, F)          # contiguous reshape, no copy
    w1a = params["w1a"].astype(compute_dtype)
    w1b = params["w1b"].astype(compute_dtype)
    w2 = params["w2"].astype(compute_dtype)
    b1 = params["b1"].astype(jnp.float32).reshape(1, H)
    b2 = params["b2"].astype(jnp.float32).reshape(1, H)
    # fold the 2-class head into a single score: softmax(l)[:,1] == sigmoid(l1 - l0)
    w_diff = (params["w3"][:, 1] - params["w3"][:, 0]).astype(jnp.float32).reshape(1, H)
    b_diff = (params["b3"][0, 1] - params["b3"][0, 0]).astype(jnp.float32).reshape(1, 1)
    memmask2 = memory_mask.astype(jnp.int32).reshape(E_pad, 1)
    envmask2 = masks.astype(jnp.float32).reshape(E_pad, 1)

    # VMEM bound: bf16 weights (~96 KiB at F=H=128) + double-buffered memory/obs blocks +
    # f32 (R, H) intermediates, with headroom; capped at v7x's 64 MiB physical VMEM.
    vmem_est = (2 * rows_per_tile * F * jnp.dtype(memory.dtype).itemsize
                + 2 * tile_envs * F * jnp.dtype(obs_features.dtype).itemsize
                + 2 * (2 * F * H + H * H) * 2
                + 6 * rows_per_tile * H * 4
                + (2 << 20))
    vmem_limit = int(min(max(vmem_est, 32 << 20), 64 << 20))

    # v7x has 2 TensorCores: splitting the env-tile axis across cores needs CORE_PARALLEL
    # (plain "parallel" does not change the split) and grid >= 2.  Default off so the
    # kernel runs unchanged on single-TC v5e/v6e and at small grids.
    if core_parallel and grid[0] >= 2 and grid[0] % 2 == 0:
        dim_sem = (pltpu.CORE_PARALLEL,)
    else:
        dim_sem = ("parallel",)

    kernel = functools.partial(_reachability_kernel, a=float(a), b=float(b),
                               tile_envs=tile_envs, mem_slots=M,
                               compute_dtype=compute_dtype)
    const = lambda r: (0, 0)

    out = pl.pallas_call(
        kernel,
        out_shape=jax.ShapeDtypeStruct((E_pad, 2), jnp.float32),
        grid_spec=pltpu.PrefetchScalarGridSpec(
            # TODO(synk): num_scalar_prefetch>=1 for memory_mask / cumulative offsets to
            # skip dead memory slots (bandwidth win proportional to memory fill fraction).
            num_scalar_prefetch=0,
            grid=grid,
            in_specs=[
                pl.BlockSpec((tile_envs, F), lambda r: (r, 0)),        # obs feats (uncast)
                pl.BlockSpec((rows_per_tile, F), lambda r: (r, 0)),    # memory, flat (uncast)
                pl.BlockSpec((F, H), const),                           # w1a bf16 (resident)
                pl.BlockSpec((F, H), const),                           # w1b bf16 (resident)
                pl.BlockSpec((1, H), const),                           # b1 f32
                pl.BlockSpec((H, H), const),                           # w2 bf16 (resident)
                pl.BlockSpec((1, H), const),                           # b2 f32
                pl.BlockSpec((1, H), const),                           # w3[:,1]-w3[:,0] f32
                pl.BlockSpec(memory_space=pltpu.MemorySpace.SMEM),     # b3[1]-b3[0] scalar
                pl.BlockSpec((tile_envs, 1), lambda r: (r, 0)),        # memory_mask int32
                pl.BlockSpec((tile_envs, 1), lambda r: (r, 0)),        # not-done masks f32
            ],
            out_specs=pl.BlockSpec((tile_envs, 2), lambda r: (r, 0)),  # [ir | sim]
        ),
        compiler_params=pltpu.CompilerParams(
            dimension_semantics=dim_sem,
            vmem_limit_bytes=vmem_limit),
    )(obs_features, mem_flat, w1a, w1b, b1, w2, b2, w_diff, b_diff,
      memmask2, envmask2)

    ir = out[:E, 0:1]
    sim = out[:E, 1]
    return ir, sim


def _reference_f32(obs_features, memory, memory_mask, masks, params, a, b):
    """Pure-f32 reference mirroring the PyTorch similarity_to_memory + act math."""
    E, F = obs_features.shape

    def r_net(x1, x2):
        h1 = jax.nn.relu(x1 @ params["w1a"] + x2 @ params["w1b"] + params["b1"])
        h2 = jax.nn.relu(h1 @ params["w2"] + params["b2"])
        return h2 @ params["w3"] + params["b3"]

    sims = []
    for e in range(E):
        n = int(memory_mask[e])
        if n == 0:
            sims.append(1.0)
        else:
            logits = r_net(jnp.broadcast_to(obs_features[e], (n, F)), memory[e, :n])
            p1 = jax.nn.softmax(logits, axis=1)[:, 1]
            sims.append(float(jnp.max(p1)))
    sims = jnp.asarray(sims, jnp.float32)
    ir = a * (b - sims) * masks
    return ir.reshape(E, 1), sims


def _reference_matched(obs_features, memory, memory_mask, masks, params, a, b, dt):
    """Reference using the same bf16 MXU operand casts / math ordering as the kernel."""
    E, F = obs_features.shape
    M = memory.shape[1]
    h_obs = jnp.dot(obs_features.astype(dt), params["w1a"].astype(dt),
                    preferred_element_type=jnp.float32) + params["b1"]
    h_mem = jnp.dot(memory.reshape(E * M, F).astype(dt), params["w1b"].astype(dt),
                    preferred_element_type=jnp.float32)
    h1 = jax.nn.relu(h_mem + jnp.repeat(h_obs, M, axis=0))
    h2 = jax.nn.relu(jnp.dot(h1.astype(dt), params["w2"].astype(dt),
                             preferred_element_type=jnp.float32) + params["b2"])
    w_diff = params["w3"][:, 1] - params["w3"][:, 0]
    b_diff = params["b3"][0, 1] - params["b3"][0, 0]
    v = jnp.sum(h2 * w_diff[None, :], axis=-1).reshape(E, M)
    valid = jnp.arange(M)[None, :] < memory_mask[:, None]
    sim = jax.nn.sigmoid(jnp.max(jnp.where(valid, v, -1e30), axis=1) + b_diff)
    sim = jnp.where(memory_mask > 0, sim, 1.0)
    ir = a * (b - sim) * masks
    return ir.reshape(E, 1), sim


if __name__ == "__main__":
    E = 4      # num_envs
    M = 32     # cfg.memory_size
    F = 128    # cfg.feature_extractor_size
    H = 128    # r_net hidden width
    a = 0.030  # cfg.curiosity_bonus_scale_a
    b = 0.5    # cfg.reward_shift_b

    key = jax.random.PRNGKey(0)
    k = jax.random.split(key, 12)

    params = {
        "w1a": jax.random.normal(k[0], (F, H), jnp.float32) * 0.05,
        "w1b": jax.random.normal(k[1], (F, H), jnp.float32) * 0.05,
        "b1":  jax.random.normal(k[2], (1, H), jnp.float32) * 0.01,
        "w2":  jax.random.normal(k[3], (H, H), jnp.float32) * 0.05,
        "b2":  jax.random.normal(k[4], (1, H), jnp.float32) * 0.01,
        "w3":  jax.random.normal(k[5], (H, 2), jnp.float32) * 0.05,
        "b3":  jax.random.normal(k[6], (1, 2), jnp.float32) * 0.01,
    }

    obs_features = jax.random.normal(k[7], (E, F), jnp.float32)
    memory = jax.random.normal(k[8], (E, M, F), jnp.float32)
    memory_mask = jnp.array([5, 0, 32, 16], jnp.int32)      # valid slots per env
    masks = jnp.array([1.0, 1.0, 0.0, 1.0], jnp.float32)    # not-done masks

    ir, sim = reachability_act(obs_features, memory, memory_mask, masks, params, a=a, b=b)
    ir = jax.block_until_ready(ir)
    sim = jax.block_until_ready(sim)
    assert ir.shape == (E, 1) and sim.shape == (E,)

    # tight check vs a reference using the same bf16 MXU operands / math ordering
    ir_m, sim_m = _reference_matched(obs_features, memory, memory_mask, masks, params,
                                     a, b, jnp.bfloat16)
    assert jnp.allclose(sim, sim_m, atol=2e-3, rtol=2e-3), (sim, sim_m)
    assert jnp.allclose(ir, ir_m, atol=2e-3, rtol=2e-3), (ir, ir_m)

    # loose check vs the pure-f32 PyTorch-mirroring reference (kernel uses bf16 MXU ops)
    ir_f, sim_f = _reference_f32(obs_features, memory, memory_mask, masks, params, a, b)
    assert jnp.allclose(sim, sim_f, atol=3e-2, rtol=3e-2), (sim, sim_f)
    assert jnp.allclose(ir, ir_f, atol=3e-2, rtol=3e-2), (ir, ir_f)

    print("KERNEL_OK")
</pallas_src>

<mosaic_0001>
module attributes {stable_mosaic.version = 11 : i64} {
  func.func @_reachability_kernel(%arg0: i32, %arg1: memref<4x128xf32, #tpu.memory_space<vmem>>, %arg2: memref<128x128xf32, #tpu.memory_space<vmem>>, %arg3: memref<128x128xbf16, #tpu.memory_space<vmem>>, %arg4: memref<128x128xbf16, #tpu.memory_space<vmem>>, %arg5: memref<1x128xf32, #tpu.memory_space<vmem>>, %arg6: memref<128x128xbf16, #tpu.memory_space<vmem>>, %arg7: memref<1x128xf32, #tpu.memory_space<vmem>>, %arg8: memref<1x128xf32, #tpu.memory_space<vmem>>, %arg9: memref<1x1xf32, #tpu.memory_space<smem>>, %arg10: memref<4x1xi32, #tpu.memory_space<vmem>>, %arg11: memref<4x1xf32, #tpu.memory_space<vmem>>, %arg12: memref<4x2xf32, #tpu.memory_space<vmem>>) attributes {dimension_semantics = [#tpu.dimension_semantics<parallel>], iteration_bounds = array<i64: 1>, scalar_prefetch = 0 : i64, scratch_operands = 0 : i64, tpu.core_type = #tpu.core_type<tc>, window_params = [{transform_indices = @transform_0, window_bounds = array<i64: 4, 128>}, {transform_indices = @transform_1, window_bounds = array<i64: 128, 128>}, {pipeline_mode = #tpu.pipeline_mode<synchronous>, transform_indices = @transform_2, window_bounds = array<i64: 128, 128>}, {pipeline_mode = #tpu.pipeline_mode<synchronous>, transform_indices = @transform_3, window_bounds = array<i64: 128, 128>}, {pipeline_mode = #tpu.pipeline_mode<synchronous>, transform_indices = @transform_4, window_bounds = array<i64: 1, 128>}, {pipeline_mode = #tpu.pipeline_mode<synchronous>, transform_indices = @transform_5, window_bounds = array<i64: 128, 128>}, {pipeline_mode = #tpu.pipeline_mode<synchronous>, transform_indices = @transform_6, window_bounds = array<i64: 1, 128>}, {pipeline_mode = #tpu.pipeline_mode<synchronous>, transform_indices = @transform_7, window_bounds = array<i64: 1, 128>}, {transform_indices = @transform_8, window_bounds = array<i64: 1, 1>}, {transform_indices = @transform_9, window_bounds = array<i64: 4, 1>}, {transform_indices = @transform_10, window_bounds = array<i64: 4, 1>}, {transform_indices = @transform_11, window_bounds = array<i64: 4, 2>}]} {
    %c0 = arith.constant 0 : index
    %c0_0 = arith.constant 0 : index
    %0 = vector.load %arg1[%c0, %c0_0] : memref<4x128xf32, #tpu.memory_space<vmem>>, vector<4x128xf32>
    %1 = arith.truncf %0 : vector<4x128xf32> to vector<4x128xbf16>
    %c0_1 = arith.constant 0 : index
    %c0_2 = arith.constant 0 : index
    %2 = vector.load %arg3[%c0_1, %c0_2] : memref<128x128xbf16, #tpu.memory_space<vmem>>, vector<128x128xbf16>
    %cst = arith.constant dense<0.000000e+00> : vector<4x128xf32>
    %3 = tpu.matmul %1, %2, %cst {dimension_numbers = #tpu.dot_dimension_numbers<[1], [0], [0], [1], [0, 0, 1, 1], [], []>} : vector<4x128xbf16>, vector<128x128xbf16>, vector<4x128xf32> -> vector<4x128xf32>
    %c0_3 = arith.constant 0 : index
    %c0_4 = arith.constant 0 : index
    %4 = vector.load %arg5[%c0_3, %c0_4] : memref<1x128xf32, #tpu.memory_space<vmem>>, vector<1x128xf32>
    %5 = vector.broadcast %4 : vector<1x128xf32> to vector<4x128xf32>
    %6 = arith.addf %3, %5 : vector<4x128xf32>
    %c0_5 = arith.constant 0 : index
    %c0_6 = arith.constant 0 : index
    %7 = vector.load %arg2[%c0_5, %c0_6] : memref<128x128xf32, #tpu.memory_space<vmem>>, vector<128x128xf32>
    %8 = arith.truncf %7 : vector<128x128xf32> to vector<128x128xbf16>
    %c0_7 = arith.constant 0 : index
    %c0_8 = arith.constant 0 : index
    %9 = vector.load %arg4[%c0_7, %c0_8] : memref<128x128xbf16, #tpu.memory_space<vmem>>, vector<128x128xbf16>
    %cst_9 = arith.constant dense<0.000000e+00> : vector<128x128xf32>
    %10 = tpu.matmul %8, %9, %cst_9 {dimension_numbers = #tpu.dot_dimension_numbers<[1], [0], [0], [1], [0, 0, 1, 1], [], []>} : vector<128x128xbf16>, vector<128x128xbf16>, vector<128x128xf32> -> vector<128x128xf32>
    %11 = vector.shape_cast %10 : vector<128x128xf32> to vector<4x32x128xf32>
    %12 = vector.shape_cast %6 : vector<4x128xf32> to vector<4x1x128xf32>
    %13 = vector.broadcast %12 : vector<4x1x128xf32> to vector<4x32x128xf32>
    %14 = arith.addf %11, %13 : vector<4x32x128xf32>
    %cst_10 = arith.constant 0.000000e+00 : f32
    %15 = vector.broadcast %cst_10 : f32 to vector<4x32x128xf32>
    %16 = arith.maximumf %14, %15 : vector<4x32x128xf32>
    %17 = vector.shape_cast %16 : vector<4x32x128xf32> to vector<128x128xf32>
    %18 = arith.truncf %17 : vector<128x128xf32> to vector<128x128xbf16>
    %c0_11 = arith.constant 0 : index
    %c0_12 = arith.constant 0 : index
    %19 = vector.load %arg6[%c0_11, %c0_12] : memref<128x128xbf16, #tpu.memory_space<vmem>>, vector<128x128xbf16>
    %cst_13 = arith.constant dense<0.000000e+00> : vector<128x128xf32>
    %20 = tpu.matmul %18, %19, %cst_13 {dimension_numbers = #tpu.dot_dimension_numbers<[1], [0], [0], [1], [0, 0, 1, 1], [], []>} : vector<128x128xbf16>, vector<128x128xbf16>, vector<128x128xf32> -> vector<128x128xf32>
    %c0_14 = arith.constant 0 : index
    %c0_15 = arith.constant 0 : index
    %21 = vector.load %arg7[%c0_14, %c0_15] : memref<1x128xf32, #tpu.memory_space<vmem>>, vector<1x128xf32>
    %22 = vector.broadcast %21 : vector<1x128xf32> to vector<128x128xf32>
    %23 = arith.addf %20, %22 : vector<128x128xf32>
    %cst_16 = arith.constant 0.000000e+00 : f32
    %24 = vector.broadcast %cst_16 : f32 to vector<128x128xf32>
    %25 = arith.maximumf %23, %24 : vector<128x128xf32>
    %26 = vector.shape_cast %25 : vector<128x128xf32> to vector<4x32x128xf32>
    %c0_17 = arith.constant 0 : index
    %c0_18 = arith.constant 0 : index
    %27 = vector.load %arg8[%c0_17, %c0_18] : memref<1x128xf32, #tpu.memory_space<vmem>>, vector<1x128xf32>
    %28 = vector.shape_cast %27 : vector<1x128xf32> to vector<1x1x128xf32>
    %29 = vector.broadcast %28 : vector<1x1x128xf32> to vector<4x32x128xf32>
    %30 = arith.mulf %26, %29 : vector<4x32x128xf32>
    %cst_19 = arith.constant dense<0.000000e+00> : vector<4x32xf32>
    %31 = vector.multi_reduction <add>, %30, %cst_19 [2] : vector<4x32x128xf32> to vector<4x32xf32>
    %32 = tpu.iota {dimensions = array<i32: 1>} : vector<4x32xi32>
    %c0_20 = arith.constant 0 : index
    %c0_21 = arith.constant 0 : index
    %33 = vector.load %arg10[%c0_20, %c0_21] : memref<4x1xi32, #tpu.memory_space<vmem>>, vector<4x1xi32>
    %34 = vector.broadcast %33 : vector<4x1xi32> to vector<4x32xi32>
    %35 = arith.cmpi slt, %32, %34 : vector<4x32xi32>
    %cst_22 = arith.constant -1.000000e+30 : f32
    %36 = vector.broadcast %cst_22 : f32 to vector<4x32xf32>
    %37 = arith.select %35, %31, %36 : vector<4x32xi1>, vector<4x32xf32>
    %cst_23 = arith.constant dense<0xFF800000> : vector<4xf32>
    %38 = vector.multi_reduction <maximumf>, %37, %cst_23 [1] : vector<4x32xf32> to vector<4xf32>
    %39 = vector.shape_cast %38 : vector<4xf32> to vector<4x1xf32>
    %c0_24 = arith.constant 0 : index
    %c0_25 = arith.constant 0 : index
    %40 = memref.load %arg9[%c0_24, %c0_25] : memref<1x1xf32, #tpu.memory_space<smem>>
    %41 = vector.broadcast %40 : f32 to vector<4x1xf32>
    %42 = arith.addf %39, %41 : vector<4x1xf32>
    %43 = arith.negf %42 : vector<4x1xf32>
    %44 = math.exp %43 : vector<4x1xf32>
    %cst_26 = arith.constant 1.000000e+00 : f32
    %45 = vector.broadcast %cst_26 : f32 to vector<4x1xf32>
    %46 = arith.addf %45, %44 : vector<4x1xf32>
    %47 = arith.divf %45, %46 : vector<4x1xf32>
    %c0_27 = arith.constant 0 : index
    %c0_28 = arith.constant 0 : index
    %48 = vector.load %arg10[%c0_27, %c0_28] : memref<4x1xi32, #tpu.memory_space<vmem>>, vector<4x1xi32>
    %c0_i32 = arith.constant 0 : i32
    %49 = vector.broadcast %c0_i32 : i32 to vector<4x1xi32>
    %50 = arith.cmpi sgt, %48, %49 : vector<4x1xi32>
    %cst_29 = arith.constant 1.000000e+00 : f32
    %51 = vector.broadcast %cst_29 : f32 to vector<4x1xf32>
    %52 = arith.select %50, %47, %51 : vector<4x1xi1>, vector<4x1xf32>
    %cst_30 = arith.constant 5.000000e-01 : f32
    %53 = vector.broadcast %cst_30 : f32 to vector<4x1xf32>
    %54 = arith.subf %53, %52 : vector<4x1xf32>
    %cst_31 = arith.constant 3.000000e-02 : f32
    %55 = vector.broadcast %cst_31 : f32 to vector<4x1xf32>
    %56 = arith.mulf %55, %54 : vector<4x1xf32>
    %c0_32 = arith.constant 0 : index
    %c0_33 = arith.constant 0 : index
    %57 = vector.load %arg11[%c0_32, %c0_33] : memref<4x1xf32, #tpu.memory_space<vmem>>, vector<4x1xf32>
    %58 = arith.mulf %56, %57 : vector<4x1xf32>
    %59 = tpu.concatenate %58, %52 in 1 : vector<4x1xf32>, vector<4x1xf32> -> vector<4x2xf32>
    %c0_34 = arith.constant 0 : index
    %c0_35 = arith.constant 0 : index
    %60 = vector.load %arg12[%c0_34, %c0_35] : memref<4x2xf32, #tpu.memory_space<vmem>>, vector<4x2xf32>
    tpu.vector_store %arg12[%c0_34, %c0_35], %59 {strides = array<i32>} : memref<4x2xf32, #tpu.memory_space<vmem>>, vector<4x2xf32>,
    return
  }
  func.func @transform_0(%arg0: i32) -> (i32, i32) {
    %c0_i32 = arith.constant 0 : i32
    %c0_i32_0 = arith.constant 0 : i32
    return %arg0, %c0_i32 : i32, i32
  }
  func.func @transform_1(%arg0: i32) -> (i32, i32) {
    %c0_i32 = arith.constant 0 : i32
    %c0_i32_0 = arith.constant 0 : i32
    return %arg0, %c0_i32 : i32, i32
  }
  func.func @transform_2(%arg0: i32) -> (i32, i32) {
    %c0_i32 = arith.constant 0 : i32
    %c0_i32_0 = arith.constant 0 : i32
    %c0_i32_1 = arith.constant 0 : i32
    return %c0_i32, %c0_i32_0 : i32, i32
  }
  func.func @transform_3(%arg0: i32) -> (i32, i32) {
    %c0_i32 = arith.constant 0 : i32
    %c0_i32_0 = arith.constant 0 : i32
    %c0_i32_1 = arith.constant 0 : i32
    return %c0_i32, %c0_i32_0 : i32, i32
  }
  func.func @transform_4(%arg0: i32) -> (i32, i32) {
    %c0_i32 = arith.constant 0 : i32
    %c0_i32_0 = arith.constant 0 : i32
    %c0_i32_1 = arith.constant 0 : i32
    return %c0_i32, %c0_i32_0 : i32, i32
  }
  func.func @transform_5(%arg0: i32) -> (i32, i32) {
    %c0_i32 = arith.constant 0 : i32
    %c0_i32_0 = arith.constant 0 : i32
    %c0_i32_1 = arith.constant 0 : i32
    return %c0_i32, %c0_i32_0 : i32, i32
  }
  func.func @transform_6(%arg0: i32) -> (i32, i32) {
    %c0_i32 = arith.constant 0 : i32
    %c0_i32_0 = arith.constant 0 : i32
    %c0_i32_1 = arith.constant 0 : i32
    return %c0_i32, %c0_i32_0 : i32, i32
  }
  func.func @transform_7(%arg0: i32) -> (i32, i32) {
    %c0_i32 = arith.constant 0 : i32
    %c0_i32_0 = arith.constant 0 : i32
    %c0_i32_1 = arith.constant 0 : i32
    return %c0_i32, %c0_i32_0 : i32, i32
  }
  func.func @transform_8(%arg0: i32) -> (i32, i32) {
    %c0_i32 = arith.constant 0 : i32
    %c0_i32_0 = arith.constant 0 : i32
    %c0_i32_1 = arith.constant 0 : i32
    return %c0_i32, %c0_i32_0 : i32, i32
  }
  func.func @transform_9(%arg0: i32) -> (i32, i32) {
    %c0_i32 = arith.constant 0 : i32
    %c0_i32_0 = arith.constant 0 : i32
    return %arg0, %c0_i32 : i32, i32
  }
  func.func @transform_10(%arg0: i32) -> (i32, i32) {
    %c0_i32 = arith.constant 0 : i32
    %c0_i32_0 = arith.constant 0 : i32
    return %arg0, %c0_i32 : i32, i32
  }
  func.func @transform_11(%arg0: i32) -> (i32, i32) {
    %c0_i32 = arith.constant 0 : i32
    %c0_i32_0 = arith.constant 0 : i32
    return %arg0, %c0_i32 : i32, i32
  }
}

</mosaic_0001>

<bundles_post_ra>
// kernel: tpu_custom_call.1
= control target key start
LH: loop header
LB: loop body
LE: loop exit
PB: predicated region body
PF: predicated region fallthrough
CT: control target
= control target key end

     0   :  { %17 = vsyncpa [#allocation4], 0  ;;  %s1392_s0 = inlined_call_operand.vmem [shape: f32[4,128], index: 0, kind: input, shape index: {}]   ;;  %s1393_s1 = inlined_call_operand.hbm [shape: f32[128,128], index: 1, kind: input, shape index: {}]   ;;  %s1394_s2 = inlined_call_operand.hbm [shape: bf16[128,128], index: 2, kind: input, shape index: {}]   ;;  %s1395_s3 = inlined_call_operand.hbm [shape: bf16[128,128], index: 3, kind: input, shape index: {}]   ;;  %s1396_s4 = inlined_call_operand.vmem [shape: f32[1,128], index: 4, kind: input, shape index: {}]   ;;  %s1397_s5 = inlined_call_operand.hbm [shape: bf16[128,128], index: 5, kind: input, shape index: {}]   ;;  %s1398_s6 = inlined_call_operand.vmem [shape: f32[1,128], index: 6, kind: input, shape index: {}]   ;;  %s1399_s7 = inlined_call_operand.vmem [shape: f32[1,128], index: 7, kind: input, shape index: {}]   ;;  %s1400_s8 = inlined_call_operand.<no memory space> [shape: f32[1,1], index: 8, kind: input, shape index: {}]   ;;  %s1401_s9 = inlined_call_operand.vmem [shape: s32[4,1], index: 9, kind: input, shape index: {}]   ;;  %s1402_s10 = inlined_call_operand.vmem [shape: f32[4,1], index: 10, kind: input, shape index: {}]   ;;  %s1403_s11 = inlined_call_operand.vmem [shape: f32[4,2], index: 11, kind: output, shape index: {}]  }
   0x1   :  { %18 = vsyncpa [#allocation6], 0 }
   0x2   :  { %19 = vsyncpa [#allocation9], 0  ;;  %s1169_s17 = smov [#allocation5]   ;;  %s1075_s21 = scalar_lea.hbm %s1394_s2, 1024 }
   0x3   :  { %s39_s18 = sshll.u32 %s1169_s17, 4  ;;  %p1076_p0 = scmp.ne.s32.totalorder %s1394_s2, %s1075_s21  ;;  %s40_s18 = int_to_ptr.vmem [resolvable:$true] %s39_s18 }
   0x4   :  { %p1079_p1 = scmp.lt.u32.totalorder %s1075_s21, %s1394_s2 }
   0x6   :  { %p1081_p2 = pnand %p1079_p1, %p1076_p0 }
   0x8   :  { %1084 = shalt.err (!%p1081_p2)
}
   0x9   :  { %s1085_s26 = scalar_lea.vmem %s40_s18, 1024  ;;  %p1090_p4 = scmp.lt.s32.totalorder %s40_s18, %s40_s18 }
   0xa   :  { %p1086_p3 = scmp.ne.s32.totalorder %s40_s18, %s1085_s26  ;;  %p1091_p5 = scmp.lt.s32.totalorder %s1085_s26, %s1085_s26 }
   0xc   :  { %p1092_p6 = por %p1091_p5, %p1090_p4 }
   0xe   :  { %p1093_p7 = pnand %p1092_p6, %p1086_p3 }
  0x10   :  { %1096 = shalt.err (!%p1093_p7)
}
  0x11   :  { %s1170_s27 = smov 64   ;;  %s1171_s28 = smov 4  }
  0x12   :  { %45 = dma.hbm_to_vmem [thread:$0]  %s1394_s2, 1024, %s40_s18, [#allocation6], %s1170_s27, %s1170_s27, %s1171_s28  }
  0x13   :  { %s1172_s12 = smov [#allocation3]   ;;  %s1097_s16 = scalar_lea.hbm %s1393_s1, 2048 }
  0x14   :  { %s27_s13 = sshll.u32 %s1172_s12, 4  ;;  %p1098_p8 = scmp.ne.s32.totalorder %s1393_s1, %s1097_s16  ;;  %s28_s13 = int_to_ptr.vmem [resolvable:$true] %s27_s13 }
  0x15   :  { %p1101_p9 = scmp.lt.u32.totalorder %s1097_s16, %s1393_s1 }
  0x17   :  { %p1103_p10 = pnand %p1101_p9, %p1098_p8 }
  0x19   :  { %1106 = shalt.err (!%p1103_p10)
}
  0x1a   :  { %s1107_s22 = scalar_lea.vmem %s28_s13, 2048  ;;  %p1112_p12 = scmp.lt.s32.totalorder %s28_s13, %s28_s13 }
  0x1b   :  { %p1108_p11 = scmp.ne.s32.totalorder %s28_s13, %s1107_s22  ;;  %p1113_p13 = scmp.lt.s32.totalorder %s1107_s22, %s1107_s22 }
  0x1d   :  { %p1114_p0 = por %p1113_p13, %p1112_p12 }
  0x1f   :  { %p1115_p1 = pnand %p1114_p0, %p1108_p11 }
  0x21   :  { %1118 = shalt.err (!%p1115_p1)
}
  0x22   :  { %s1173_s2 = smov 128   ;;  %s1174_s18 = smov 8  }
  0x23   :  { %33 = dma.hbm_to_vmem [thread:$0]  %s1393_s1, 2048, %s28_s13, [#allocation4], %s1173_s2, %s1173_s2, %s1174_s18  }
  0x24   :  { %s1175_s25 = smov [#allocation7]   ;;  %s1176_s29 = smov [#allocation8]  }
  0x25   :  { %s51_s26 = sshll.u32 %s1175_s25, 4  ;;  %s65_s30 = sshll.u32 %s1176_s29, 4  ;;  %s52_s26 = int_to_ptr.vmem [resolvable:$true] %s51_s26  ;;  %s1269_s30 = int_to_ptr.vmem [resolvable:$true] %s65_s30 }
  0x26   :  { %s1119_s15 = scalar_lea.hbm %s1395_s3, 1024 }
  0x27   :  { %p1120_p2 = scmp.ne.s32.totalorder %s1395_s3, %s1119_s15  ;;  %p1123_p3 = scmp.lt.u32.totalorder %s1119_s15, %s1395_s3 }
  0x29   :  { %p1125_p4 = pnand %p1123_p3, %p1120_p2 }
  0x2b   :  { %1128 = shalt.err (!%p1125_p4)
}
  0x2c   :  { %s1129_s1 = scalar_lea.vmem %s52_s26, 1024  ;;  %p1134_p6 = scmp.lt.s32.totalorder %s52_s26, %s52_s26 }
  0x2d   :  { %p1130_p5 = scmp.ne.s32.totalorder %s52_s26, %s1129_s1  ;;  %p1135_p7 = scmp.lt.s32.totalorder %s1129_s1, %s1129_s1 }
  0x2f   :  { %p1136_p8 = por %p1135_p7, %p1134_p6 }
  0x31   :  { %p1137_p9 = pnand %p1136_p8, %p1130_p5 }
  0x33   :  { %1140 = shalt.err (!%p1137_p9)
}
  0x34   :  { %57 = dma.hbm_to_vmem [thread:$0]  %s1395_s3, 1024, %s52_s26, [#allocation6], %s1170_s27, %s1170_s27, %s1171_s28  }
  0x35   :  { %s1141_s18 = scalar_lea.hbm %s1397_s5, 1024 }
  0x36   :  { %p1142_p10 = scmp.ne.s32.totalorder %s1397_s5, %s1141_s18  ;;  %p1145_p11 = scmp.lt.u32.totalorder %s1141_s18, %s1397_s5 }
  0x38   :  { %p1147_p12 = pnand %p1145_p11, %p1142_p10 }
  0x3a   :  { %1150 = shalt.err (!%p1147_p12)
}
  0x3b   :  { %s1151_s12 = scalar_lea.vmem %s1269_s30, 1024  ;;  %p1156_p0 = scmp.lt.s32.totalorder %s1269_s30, %s1269_s30 }
  0x3c   :  { %p1152_p13 = scmp.ne.s32.totalorder %s1269_s30, %s1151_s12  ;;  %p1157_p1 = scmp.lt.s32.totalorder %s1151_s12, %s1151_s12 }
  0x3e   :  { %p1158_p2 = por %p1157_p1, %p1156_p0 }
  0x40   :  { %p1159_p3 = pnand %p1158_p2, %p1152_p13 }
  0x42   :  { %1162 = shalt.err (!%p1159_p3)
}
  0x43   :  { %71 = dma.hbm_to_vmem [thread:$0]  %s1397_s5, 1024, %s1269_s30, [#allocation9], %s1170_s27, %s1170_s27, %s1171_s28  }
  0x44   :  { %1163 = dma.done.wait [#allocation4], 2048  }
  0x45   :  { %1164 = vsyncadd [#allocation4], 4294965248 }
  0x46   :  { %1165 = dma.done.wait [#allocation6], 2048  }
  0x47   :  { %1166 = vsyncadd [#allocation6], 4294965248 }
  0x48   :  { %1167 = dma.done.wait [#allocation9], 1024  }
  0x49   :  { %1168 = vsyncadd [#allocation9], 4294966272  ;;  %v1177_v0 = vmov 0.0   ;;  %vm1178_vm0 = vmmov 0   ;;  %v1047_v1 = vld [vmem:[#allocation5] sm:$0xff]   ;;  %v1049_v3 = vld [vmem:[#allocation5 + $0x8] sm:$0xff]   ;;  %v397_v53 = vlaneseq }
  0x4a   :  { %933 = vmatprep.subr.bf16.mxu0 %v1177_v0  ;;  %949 = vmatprep.mubr.msk.bf16.mxu0 %vm1178_vm0, %v1177_v0  ;;  %v1048_v2 = vld [vmem:[#allocation7] sm:$0xff]   ;;  %v1050_v4 = vld [vmem:[#allocation7 + $0x8] sm:$0xff]   ;;  %v1052_v5 = vld [vmem:[#allocation7 + $0x10] sm:$0xff]   ;;  %v1179_v51 = vmov 1966171168   ;;  %vm749_vm1 = vcmask 130112  }
  0x4b   :  { %934 = vmatpush3.bf16.msra.mxu0 %v1047_v1  ;;  %953 = vmatprep.subr.bf16.mxu1 %v1048_v2  ;;  %v1051_v6 = vld [vmem:[#allocation5 + $0x10] sm:$0xff]   ;;  %v1054_v7 = vld [vmem:[#allocation7 + $0x18] sm:$0xff]   ;;  %v1056_v9 = vld [vmem:[#allocation7 + $0x20] sm:$0xff]   ;;  %v395_v52 = vunpack.c.l.s4 %v1179_v51  ;;  %v1310_v55 = vshrl.u32 %v397_v53, 7  ;;  %vm756_vm2 = vcmask 195712   ;;  %vm763_vm3 = vcmask 261312  }
  0x4c   :  { %935 = vmatprep.subr.bf16.mxu0 %v1177_v0  ;;  %954 = vmatpush3.bf16.msra.mxu1 %v1048_v2  ;;  %v1053_v8 = vld [vmem:[#allocation5 + $0x18] sm:$0xff]   ;;  %v1055_v10 = vld [vmem:[#allocation5 + $0x20] sm:$0xff]   ;;  %v209_v12 = vld [vmem:[#allocation3 + $0x8] sm:$0xff]  ;;  %vm822_vm4 = vcmask 1041409   ;;  %vm824_vm5 = vcmask 1042434   ;;  %vm826_vm6 = vcmask 1043459  }
  0x4d   :  { %955 = vmatprep.subr.bf16.mxu1 %v1050_v4  ;;  %v208_v11 = vld [vmem:[#allocation3] sm:$0xff]  ;;  %v1058_v13 = vld [vmem:[#allocation7 + $0x28] sm:$0xff]   ;;  %v1060_v16 = vld [vmem:[#allocation7 + $0x30] sm:$0xff]   ;;  %v396_v54 = vunpack.c.0.s8 %v395_v52  ;;  %vm830_vm8 = vcmask 257024   ;;  %s1181_s17 = smov 1   ;;  %vm853_vm10 = vcmask 7168  }
  0x4e   :  { %v224_v14 = vpack.c.bf16 %v209_v12, %v208_v11  ;;  %v1057_v15 = vld [vmem:[#allocation5 + $0x28] sm:$0xff]   ;;  %v1059_v17 = vld [vmem:[#allocation5 + $0x30] sm:$0xff]   ;;  %v1061_v18 = vld [vmem:[#allocation5 + $0x38] sm:$0xff]   ;;  %vm855_vm11 = vcmask 11264  }
  0x4f   :  { %936 = vmatpush3.bf16.msra.mxu0 %v1049_v3  ;;  %v1062_v19 = vld [vmem:[#allocation7 + $0x38] sm:$0xff]   ;;  %v95_v20 = vld [vmem:[%s1392_s0] sm:$0xf]  ;;  %v210_v22 = vld [vmem:[#allocation3 + $0x10] sm:$0xff]  ;;  %v399_v57 = vsub.s32 %v396_v54, %v1310_v55 }
  0x50   :  { %937 = vmatprep.subr.bf16.mxu0 %v1177_v0  ;;  %956 = vmatpush3.bf16.msra.mxu1 %v1050_v4  ;;  %v1063_v21 = vld [vmem:[#allocation8] sm:$0xff]   ;;  %v211_v23 = vld [vmem:[#allocation3 + $0x18] sm:$0xff]  ;;  %v96_v24 = vpack.c.bf16 %v95_v20, %v95_v20  ;;  %v213_v26 = vld [vmem:[#allocation3 + $0x28] sm:$0xff] }
  0x51   :  { %957 = vmatprep.subr.bf16.mxu1 %v1052_v5  ;;  %969 = vmatprep.mubr.bf16.mxu1 %v224_v14  ;;  %v212_v25 = vld [vmem:[#allocation3 + $0x20] sm:$0xff]  ;;  %v225_v27 = vpack.c.bf16 %v211_v23, %v210_v22  ;;  %v1064_v28 = vld [vmem:[#allocation8 + $0x8] sm:$0xff]   ;;  %v1065_v30 = vld [vmem:[#allocation8 + $0x10] sm:$0xff]  }
  0x52   :  { %v226_v29 = vpack.c.bf16 %v213_v26, %v212_v25  ;;  %v214_v31 = vld [vmem:[#allocation3 + $0x30] sm:$0xff]  ;;  %v215_v32 = vld [vmem:[#allocation3 + $0x38] sm:$0xff]  ;;  %v216_v33 = vld [vmem:[#allocation3 + $0x40] sm:$0xff] }
  0x53   :  { %938 = vmatpush3.bf16.msra.mxu0 %v1051_v6  ;;  %v217_v34 = vld [vmem:[#allocation3 + $0x48] sm:$0xff]  ;;  %v227_v35 = vpack.c.bf16 %v215_v32, %v214_v31  ;;  %v1066_v36 = vld [vmem:[#allocation8 + $0x18] sm:$0xff]   ;;  %v218_v38 = vld [vmem:[#allocation3 + $0x50] sm:$0xff] }
  0x54   :  { %939 = vmatprep.subr.bf16.mxu0 %v1177_v0  ;;  %958 = vmatpush3.bf16.msra.mxu1 %v1052_v5  ;;  %v228_v37 = vpack.c.bf16 %v217_v34, %v216_v33  ;;  %v219_v39 = vld [vmem:[#allocation3 + $0x58] sm:$0xff]  ;;  %v220_v40 = vld [vmem:[#allocation3 + $0x60] sm:$0xff]  ;;  %v221_v41 = vld [vmem:[#allocation3 + $0x68] sm:$0xff] }
  0x55   :  { %959 = vmatprep.subr.bf16.mxu1 %v1054_v7  ;;  %v229_v42 = vpack.c.bf16 %v219_v39, %v218_v38  ;;  %v230_v43 = vpack.c.bf16 %v221_v41, %v220_v40  ;;  %v222_v44 = vld [vmem:[#allocation3 + $0x70] sm:$0xff]  ;;  %v223_v45 = vld [vmem:[#allocation3 + $0x78] sm:$0xff]  ;;  %v1067_v47 = vld [vmem:[#allocation8 + $0x20] sm:$0xff]  }
  0x56   :  { %v231_v46 = vpack.c.bf16 %v223_v45, %v222_v44  ;;  %v1068_v48 = vld [vmem:[#allocation8 + $0x28] sm:$0xff]   ;;  %v1069_v49 = vld [vmem:[#allocation8 + $0x30] sm:$0xff]   ;;  %v1070_v50 = vld [vmem:[#allocation8 + $0x38] sm:$0xff]  }
  0x57   :  { %940 = vmatpush3.bf16.msra.mxu0 %v1053_v8  ;;  %v864_v56 = vld [vmem:[%s1396_s4] ss:$0 sm:$0xff] }
  0x58   :  { %941 = vmatprep.subr.bf16.mxu0 %v1177_v0  ;;  %960 = vmatpush3.bf16.msra.mxu1 %v1054_v7 }
  0x59   :  { %961 = vmatprep.subr.bf16.mxu1 %v1056_v9 }
  0x5b   :  { %942 = vmatpush3.bf16.msra.mxu0 %v1055_v10 }
  0x5c   :  { %943 = vmatprep.subr.bf16.mxu0 %v1177_v0  ;;  %962 = vmatpush3.bf16.msra.mxu1 %v1056_v9 }
  0x5d   :  { %963 = vmatprep.subr.bf16.mxu1 %v1058_v13 }
  0x5f   :  { %944 = vmatpush3.bf16.msra.mxu0 %v1057_v15 }
  0x60   :  { %945 = vmatprep.subr.bf16.mxu0 %v1177_v0  ;;  %964 = vmatpush3.bf16.msra.mxu1 %v1058_v13 }
  0x61   :  { %965 = vmatprep.subr.bf16.mxu1 %v1060_v16 }
  0x63   :  { %946 = vmatpush3.bf16.msra.mxu0 %v1059_v17 }
  0x64   :  { %947 = vmatprep.subr.bf16.mxu0 %v1177_v0  ;;  %966 = vmatpush3.bf16.msra.mxu1 %v1060_v16  ;;  %v420_v0 = vsub.s32 0, %v1310_v55 }
  0x65   :  { %967 = vmatprep.subr.bf16.mxu1 %v1062_v19 }
  0x67   :  { %948 = vmatpush3.bf16.msra.mxu0 %v1061_v18 }
  0x68   :  { %985 = vmatprep.subr.bf16.mxu0 %v1063_v21  ;;  %968 = vmatpush3.bf16.msra.mxu1 %v1062_v19 }
  0x69   :  { %1017 = vmatprep.subr.bf16.mxu1 %v1063_v21 }
  0x6a   :  { %950 = vmatmul.mubr.bf16.vlgmr.msra.gmra.mrb[0].mxu0 %v96_v24 }
  0x6b   :  { %986 = vmatpush3.bf16.msra.mxu0 %v1063_v21  ;;  %970 = vmatmul.mubr.bf16.vlgmr.msra.gmra.mrb[0].mxu1 %v225_v27 }
  0x6c   :  { %987 = vmatprep.subr.bf16.mxu0 %v1064_v28  ;;  %973 = vmatprep.mubr.bf16.mxu1 %v226_v29 }
  0x6d   :  { %1025 = vmatpush3.bf16.msra.mxu1 %v1063_v21 }
  0x6e   :  { %1018 = vmatprep.subr.bf16.mxu1 %v1064_v28 }
  0x6f   :  { %988 = vmatpush3.bf16.msra.mxu0 %v1064_v28 }
  0x70   :  { %989 = vmatprep.subr.bf16.mxu0 %v1065_v30 }
  0x71   :  { %1026 = vmatpush3.bf16.msra.mxu1 %v1064_v28 }
  0x72   :  { %1019 = vmatprep.subr.bf16.mxu1 %v1065_v30 }
  0x73   :  { %990 = vmatpush3.bf16.msra.mxu0 %v1065_v30  ;;  %974 = vmatmul.mubr.bf16.gmra.mrb[4].mxu1 %v227_v35 }
  0x74   :  { %991 = vmatprep.subr.bf16.mxu0 %v1066_v36  ;;  %977 = vmatprep.mubr.bf16.mxu1 %v228_v37 }
  0x75   :  { %1027 = vmatpush3.bf16.msra.mxu1 %v1065_v30 }
  0x76   :  { %1020 = vmatprep.subr.bf16.mxu1 %v1066_v36 }
  0x77   :  { %992 = vmatpush3.bf16.msra.mxu0 %v1066_v36 }
  0x78   :  { %993 = vmatprep.subr.bf16.mxu0 %v1067_v47 }
  0x79   :  { %1028 = vmatpush3.bf16.msra.mxu1 %v1066_v36 }
  0x7a   :  { %1021 = vmatprep.subr.bf16.mxu1 %v1067_v47 }
  0x7b   :  { %978 = vmatmul.mubr.bf16.gmra.mrb[8].mxu1 %v229_v42  ;;  %994 = vmatpush3.bf16.msra.mxu0 %v1067_v47 }
  0x7c   :  { %981 = vmatprep.mubr.bf16.mxu1 %v230_v43  ;;  %995 = vmatprep.subr.bf16.mxu0 %v1068_v48 }
  0x7d   :  { %1029 = vmatpush3.bf16.msra.mxu1 %v1067_v47 }
  0x7e   :  { %1022 = vmatprep.subr.bf16.mxu1 %v1068_v48 }
  0x7f   :  { %996 = vmatpush3.bf16.msra.mxu0 %v1068_v48 }
  0x80   :  { %997 = vmatprep.subr.bf16.mxu0 %v1069_v49 }
  0x81   :  { %1030 = vmatpush3.bf16.msra.mxu1 %v1068_v48 }
  0x82   :  { %1023 = vmatprep.subr.bf16.mxu1 %v1069_v49 }
  0x83   :  { %982 = vmatmul.mubr.bf16.gmra.mrb[12].mxu1 %v231_v46  ;;  %998 = vmatpush3.bf16.msra.mxu0 %v1069_v49 }
  0x84   :  { %999 = vmatprep.subr.bf16.mxu0 %v1070_v50 }
  0x85   :  { %1031 = vmatpush3.bf16.msra.mxu1 %v1069_v49 }
  0x86   :  { %1024 = vmatprep.subr.bf16.mxu1 %v1070_v50 }
  0x87   :  { %1000 = vmatpush3.bf16.msra.mxu0 %v1070_v50 }
  0x89   :  { %1032 = vmatpush3.bf16.msra.mxu1 %v1070_v50 }
 0x13d   :  { %v202_v58 = vpop.f32.mrb[0].mxu0 }
 0x13e   :  { %v203_v59 = vadd.f32 %v864_v56, %v202_v58  ;;  %v951_v60 = vpop.f32.mrb[1].mxu0  ;;  %v971_v62 = vpop.f32.mrb[0].mxu1 }
 0x13f   :  { %v205_v61 = vpop.f32.mrb[2].mxu0  ;;  %v330_v2 = vpop.f32.mrb[1].mxu1 }
 0x140   :  { %v400_v63 = vrot.slane %v203_v59, %v399_v57  ;;  %v952_v1 = vpop.f32.mrb[3].mxu0  ;;  %v972_v3 = vpop.f32.mrb[2].mxu1 }
 0x141   :  { %v333_v6 = vpop.f32.mrb[3].mxu1 }
 0x142   :  { %v401_v4 = vcombine.high %v400_v63, %v400_v63  ;;  %v408_v5 = vrot.slane %v400_v63, %v399_v57 }
 0x144   :  { %v415_v7 = vrot.slane %v401_v4, %v399_v57  ;;  %v421_v8 = vrot.slane %v408_v5, %v420_v0  ;;  %v416_v23 = vcombine.high %v408_v5, %v408_v5  ;;  %v1320_v5 = vld [vmem:[%s1398_s6] ss:$0 sm:$0xff] }
 0x146   :  { %v440_v9 = vadd.f32 %v971_v62, %v421_v8  ;;  %v438_v10 = vadd.f32 %v421_v8, %v330_v2  ;;  %v441_v11 = vadd.f32 %v972_v3, %v421_v8  ;;  %v439_v12 = vadd.f32 %v421_v8, %v333_v6  ;;  %v975_v13 = vpop.f32.mrb[4].mxu1 }
 0x147   :  { %v425_v14 = vrot.slane %v415_v7, %v420_v0  ;;  %v346_v18 = vpop.f32.mrb[5].mxu1  ;;  %v429_v34 = vrot.slane %v416_v23, %v420_v0  ;;  %v417_v41 = vcombine.high %v415_v7, %v415_v7 }
 0x148   :  { %v456_v15 = vmax.f32 %v440_v9, 0.0  ;;  %v454_v16 = vmax.f32 %v438_v10, 0.0  ;;  %v457_v17 = vmax.f32 %v441_v11, 0.0  ;;  %v455_v19 = vmax.f32 %v439_v12, 0.0  ;;  %v976_v22 = vpop.f32.mrb[6].mxu1 }
 0x149   :  { %v444_v20 = vadd.f32 %v975_v13, %v425_v14  ;;  %v442_v21 = vadd.f32 %v425_v14, %v346_v18  ;;  %v445_v25 = vadd.f32 %v976_v22, %v425_v14  ;;  %v349_v26 = vpop.f32.mrb[7].mxu1  ;;  %v433_v50 = vrot.slane %v417_v41, %v420_v0  ;;  %v1327_v11 = vld [vmem:[%s1399_s7] ss:$0 sm:$0xff] }
 0x14a   :  { %v471_v24 = vpack.c.bf16 %v457_v17, %v456_v15  ;;  %v470_v27 = vpack.c.bf16 %v455_v19, %v454_v16  ;;  %v443_v29 = vadd.f32 %v425_v14, %v349_v26  ;;  %v1180_v0 = vmov 0  }
 0x14b   :  { %v460_v28 = vmax.f32 %v444_v20, 0.0  ;;  %v461_v30 = vmax.f32 %v445_v25, 0.0  ;;  %v458_v31 = vmax.f32 %v442_v21, 0.0  ;;  %1046 = vset.pattern.permute.xlu0 %v1180_v0 }
 0x14c   :  { %v459_v32 = vmax.f32 %v443_v29, 0.0  ;;  %1001 = vmatprep.mubr.bf16.mxu0 %v470_v27 }
 0x14d   :  { %v473_v33 = vpack.c.bf16 %v461_v30, %v460_v28  ;;  %1002 = vmatmul.mubr.bf16.vlgmr.msra.gmra.mrb[4].mxu0 %v471_v24 }
 0x14e   :  { %v472_v35 = vpack.c.bf16 %v459_v32, %v458_v31  ;;  %v979_v36 = vpop.f32.mrb[8].mxu1 }
 0x14f   :  { %v448_v37 = vadd.f32 %v979_v36, %v429_v34  ;;  %v362_v38 = vpop.f32.mrb[9].mxu1 }
 0x150   :  { %v446_v39 = vadd.f32 %v429_v34, %v362_v38  ;;  %v980_v40 = vpop.f32.mrb[10].mxu1  ;;  %1005 = vmatprep.mubr.bf16.mxu0 %v472_v35 }
 0x151   :  { %v449_v42 = vadd.f32 %v980_v40, %v429_v34  ;;  %v365_v43 = vpop.f32.mrb[11].mxu1  ;;  %v464_v45 = vmax.f32 %v448_v37, 0.0 }
 0x152   :  { %v447_v44 = vadd.f32 %v429_v34, %v365_v43  ;;  %v462_v47 = vmax.f32 %v446_v39, 0.0 }
 0x153   :  { %v465_v46 = vmax.f32 %v449_v42, 0.0 }
 0x154   :  { %v463_v48 = vmax.f32 %v447_v44, 0.0 }
 0x155   :  { %v475_v49 = vpack.c.bf16 %v465_v46, %v464_v45  ;;  %1006 = vmatmul.mubr.bf16.gmra.mrb[8].mxu0 %v473_v33 }
 0x156   :  { %v474_v51 = vpack.c.bf16 %v463_v48, %v462_v47  ;;  %v983_v52 = vpop.f32.mrb[12].mxu1 }
 0x157   :  { %v452_v54 = vadd.f32 %v983_v52, %v433_v50  ;;  %v378_v56 = vpop.f32.mrb[13].mxu1 }
 0x158   :  { %v450_v57 = vadd.f32 %v433_v50, %v378_v56  ;;  %v984_v58 = vpop.f32.mrb[14].mxu1  ;;  %1009 = vmatprep.mubr.bf16.mxu1 %v474_v51 }
 0x159   :  { %v453_v59 = vadd.f32 %v984_v58, %v433_v50  ;;  %v381_v60 = vpop.f32.mrb[15].mxu1  ;;  %1010 = vmatmul.mubr.bf16.vlgmr.msra.gmra.mrb[16].mxu1 %v475_v49  ;;  %v468_v62 = vmax.f32 %v452_v54, 0.0 }
 0x15a   :  { %v451_v61 = vadd.f32 %v433_v50, %v381_v60  ;;  %v466_v1 = vmax.f32 %v450_v57, 0.0 }
 0x15b   :  { %v469_v63 = vmax.f32 %v453_v59, 0.0 }
 0x15c   :  { %v467_v2 = vmax.f32 %v451_v61, 0.0 }
 0x15d   :  { %v477_v3 = vpack.c.bf16 %v469_v63, %v468_v62 }
 0x15e   :  { %v476_v4 = vpack.c.bf16 %v467_v2, %v466_v1 }
 0x160   :  { %1013 = vmatprep.mubr.bf16.mxu1 %v476_v4 }
 0x161   :  { %1014 = vmatmul.mubr.bf16.gmra.mrb[20].mxu1 %v477_v3 }
 0x220   :  { %v1003_v6 = vpop.f32.mrb[4].mxu0 }
 0x221   :  { %v592_v7 = vadd.f32 %v1003_v6, %v1320_v5  ;;  %v583_v8 = vpop.f32.mrb[5].mxu0 }
 0x222   :  { %v584_v9 = vadd.f32 %v1320_v5, %v583_v8  ;;  %v1004_v10 = vpop.f32.mrb[6].mxu0 }
 0x223   :  { %v648_v12 = vmax.f32 %v592_v7, 0.0  ;;  %v586_v13 = vpop.f32.mrb[7].mxu0  ;;  %v595_v14 = vadd.f32 %v1004_v10, %v1320_v5  ;;  %v1362_v10 = vld [vmem:[%s1401_s9] sm:$0xf] }
 0x224   :  { %v646_v15 = vmax.f32 %v584_v9, 0.0  ;;  %v587_v18 = vadd.f32 %v1320_v5, %v586_v13  ;;  %vm843_vm9 = vcmp.gt.s32.totalorder %v1362_v10, 0 }
 0x225   :  { %v671_v16 = vmul.f32 %v1327_v11, %v648_v12  ;;  %v649_v17 = vmax.f32 %v595_v14, 0.0 }
 0x226   :  { %v669_v22 = vmul.f32 %v1327_v11, %v646_v15  ;;  %v647_v27 = vmax.f32 %v587_v18, 0.0 }
 0x227   :  { %689 = vadd.xlane.f32.xlu0 %v671_v16  ;;  %v672_v29 = vmul.f32 %v1327_v11, %v649_v17 }
 0x228   :  { %v1007_v19 = vpop.f32.mrb[8].mxu0  ;;  %v670_v38 = vmul.f32 %v1327_v11, %v647_v27 }
 0x229   :  { %v608_v20 = vadd.f32 %v1007_v19, %v1320_v5  ;;  %v599_v21 = vpop.f32.mrb[9].mxu0  ;;  %v718_v19 = vand.u32 127, %v397_v53 }
 0x22a   :  { %v600_v23 = vadd.f32 %v1320_v5, %v599_v21  ;;  %v1008_v24 = vpop.f32.mrb[10].mxu0 }
 0x22b   :  { %v652_v25 = vmax.f32 %v608_v20, 0.0  ;;  %v602_v26 = vpop.f32.mrb[11].mxu0  ;;  %685 = vadd.xlane.f32.xlu0 %v669_v22  ;;  %v611_v31 = vadd.f32 %v1008_v24, %v1320_v5  ;;  %v744_v20 = vadd.s32 4294967288, %v718_v19 }
 0x22c   :  { %v1011_v28 = vpop.f32.mrb[16].mxu1  ;;  %v650_v30 = vmax.f32 %v600_v23, 0.0  ;;  %v603_v37 = vadd.f32 %v1320_v5, %v602_v26  ;;  %v751_v23 = vadd.s32 4294967280, %v718_v19  ;;  %v742_v26 = vsub.s32 %v718_v19, %v1310_v55 }
 0x22d   :  { %v624_v32 = vadd.f32 %v1011_v28, %v1320_v5  ;;  %v615_v33 = vpop.f32.mrb[17].mxu1  ;;  %v675_v34 = vmul.f32 %v1327_v11, %v652_v25  ;;  %v653_v39 = vmax.f32 %v611_v31, 0.0  ;;  %v747_v22 = vsub.s32 %v744_v20, %v1310_v55 }
 0x22e   :  { %v1012_v35 = vpop.f32.mrb[18].mxu1  ;;  %v616_v41 = vadd.f32 %v1320_v5, %v615_v33  ;;  %v673_v42 = vmul.f32 %v1327_v11, %v650_v30  ;;  %v651_v43 = vmax.f32 %v603_v37, 0.0  ;;  %v758_v28 = vadd.s32 4294967272, %v718_v19 }
 0x22f   :  { %v618_v36 = vpop.f32.mrb[19].mxu1  ;;  %697 = vadd.xlane.f32.xlu1 %v675_v34  ;;  %691 = vadd.xlane.f32.xlu0 %v672_v29  ;;  %v656_v40 = vmax.f32 %v624_v32, 0.0  ;;  %v627_v44 = vadd.f32 %v1012_v35, %v1320_v5  ;;  %v676_v49 = vmul.f32 %v1327_v11, %v653_v39  ;;  %v754_v31 = vsub.s32 %v751_v23, %v1310_v55 }
 0x230   :  { %v654_v46 = vmax.f32 %v616_v41, 0.0  ;;  %v619_v54 = vadd.f32 %v1320_v5, %v618_v36  ;;  %v674_v56 = vmul.f32 %v1327_v11, %v651_v43  ;;  %v761_v37 = vsub.s32 %v758_v28, %v1310_v55 }
 0x231   :  { %v679_v50 = vmul.f32 %v1327_v11, %v656_v40  ;;  %v657_v57 = vmax.f32 %v627_v44, 0.0 }
 0x232   :  { %v677_v60 = vmul.f32 %v1327_v11, %v654_v46  ;;  %v655_v61 = vmax.f32 %v619_v54, 0.0 }
 0x233   :  { %693 = vadd.xlane.f32.xlu1 %v673_v42  ;;  %687 = vadd.xlane.f32.xlu0 %v670_v38  ;;  %v680_v1 = vmul.f32 %v1327_v11, %v657_v57 }
 0x234   :  { %v1015_v45 = vpop.f32.mrb[20].mxu1  ;;  %v678_v0 = vmul.f32 %v1327_v11, %v655_v61 }
 0x235   :  { %v640_v47 = vadd.f32 %v1015_v45, %v1320_v5  ;;  %v631_v48 = vpop.f32.mrb[21].mxu1 }
 0x236   :  { %v1016_v51 = vpop.f32.mrb[22].mxu1  ;;  %v632_v62 = vadd.f32 %v1320_v5, %v631_v48 }
 0x237   :  { %v634_v52 = vpop.f32.mrb[23].mxu1  ;;  %699 = vadd.xlane.f32.xlu1 %v676_v49  ;;  %705 = vadd.xlane.f32.xlu0 %v679_v50  ;;  %v660_v58 = vmax.f32 %v640_v47, 0.0  ;;  %v643_v4 = vadd.f32 %v1016_v51, %v1320_v5 }
 0x238   :  { %v635_v59 = vadd.f32 %v1320_v5, %v634_v52  ;;  %v658_v3 = vmax.f32 %v632_v62, 0.0 }
 0x239   :  { %v683_v2 = vmul.f32 %v1327_v11, %v660_v58  ;;  %v661_v7 = vmax.f32 %v643_v4, 0.0 }
 0x23a   :  { %v659_v63 = vmax.f32 %v635_v59, 0.0  ;;  %v681_v8 = vmul.f32 %v1327_v11, %v658_v3 }
 0x23b   :  { %695 = vadd.xlane.f32.xlu1 %v674_v56  ;;  %701 = vadd.xlane.f32.xlu0 %v677_v60  ;;  %v684_v9 = vmul.f32 %v1327_v11, %v661_v7 }
 0x23c   :  { %v682_v6 = vmul.f32 %v1327_v11, %v659_v63 }
 0x23f   :  { %707 = vadd.xlane.f32.xlu1 %v680_v1  ;;  %713 = vadd.xlane.f32.xlu0 %v683_v2 }
 0x243   :  { %703 = vadd.xlane.f32.xlu1 %v678_v0  ;;  %711 = vadd.xlane.f32.xlu0 %v682_v6  ;;  %v835_v0 = vstv %s1400_s8 }
 0x247   :  { %709 = vadd.xlane.f32.xlu1 %v681_v8 }
 0x24b   :  { %715 = vadd.xlane.f32.xlu1 %v684_v9 }
 0x259   :  { %721 = vperm.xlu0 %1046, %v1362_v10  }
 0x2b4   :  { %v690_v5 = vpop.xlane.xlu0 %689 }
 0x2b5   :  { %v755_v42 = vrot.slane %v690_v5, %v754_v31 }
 0x2b8   :  { %v686_v12 = vpop.xlane.xlu0 %685 }
 0x2b9   :  { %v743_v33 = vrot.slane %v686_v12, %v742_v26 }
 0x2bc   :  { %v698_v13 = vpop.xlane.xlu1 %697  ;;  %v692_v14 = vpop.xlane.xlu0 %691 }
 0x2bd   :  { %v777_v36 = vrot.slane %v698_v13, %v754_v31  ;;  %v762_v55 = vrot.slane %v692_v14, %v761_v37 }
 0x2c0   :  { %v694_v15 = vpop.xlane.xlu1 %693  ;;  %v688_v16 = vpop.xlane.xlu0 %687 }
 0x2c1   :  { %v768_v29 = vrot.slane %v694_v15, %v742_v26  ;;  %v748_v30 = vrot.slane %v688_v16, %v747_v22  ;;  %v847_v16 = vld [vmem:[%s1402_s10] sm:$0xf] }
 0x2c3   :  { %v750_v39 = vsel %vm749_vm1, %v748_v30, %v743_v33 }
 0x2c4   :  { %v700_v17 = vpop.xlane.xlu1 %699  ;;  %v706_v18 = vpop.xlane.xlu0 %705  ;;  %v757_v49 = vsel %vm756_vm2, %v755_v42, %v750_v39 }
 0x2c5   :  { %v796_v40 = vrot.slane %v706_v18, %v754_v31  ;;  %v782_v45 = vrot.slane %v700_v17, %v761_v37  ;;  %v764_v60 = vsel %vm763_vm3, %v762_v55, %v757_v49 }
 0x2c8   :  { %v696_v11 = vpop.xlane.xlu1 %695  ;;  %v702_v21 = vpop.xlane.xlu0 %701 }
 0x2c9   :  { %v772_v27 = vrot.slane %v696_v11, %v747_v22  ;;  %v787_v34 = vrot.slane %v702_v21, %v742_v26 }
 0x2cb   :  { %v773_v53 = vsel %vm749_vm1, %v772_v27, %v768_v29 }
 0x2cc   :  { %v708_v24 = vpop.xlane.xlu1 %707  ;;  %v714_v25 = vpop.xlane.xlu0 %713  ;;  %v778_v43 = vsel %vm756_vm2, %v777_v36, %v773_v53 }
 0x2cd   :  { %v801_v50 = vrot.slane %v708_v24, %v761_v37  ;;  %v783_v52 = vsel %vm763_vm3, %v782_v45, %v778_v43  ;;  %v815_v54 = vrot.slane %v714_v25, %v754_v31 }
 0x2ce   :  { %v823_v62 = vsel %vm822_vm4, %v783_v52, %v764_v60 }
 0x2d0   :  { %v704_v32 = vpop.xlane.xlu1 %703  ;;  %v712_v38 = vpop.xlane.xlu0 %711 }
 0x2d1   :  { %v791_v35 = vrot.slane %v704_v32, %v747_v22  ;;  %v810_v47 = vrot.slane %v712_v38, %v747_v22 }
 0x2d3   :  { %v792_v41 = vsel %vm749_vm1, %v791_v35, %v787_v34 }
 0x2d4   :  { %v710_v44 = vpop.xlane.xlu1 %709  ;;  %v797_v46 = vsel %vm756_vm2, %v796_v40, %v792_v41 }
 0x2d5   :  { %v806_v48 = vrot.slane %v710_v44, %v742_v26  ;;  %v802_v58 = vsel %vm763_vm3, %v801_v50, %v797_v46 }
 0x2d6   :  { %v825_v1 = vsel %vm824_vm5, %v802_v58, %v823_v62 }
 0x2d7   :  { %v811_v51 = vsel %vm749_vm1, %v810_v47, %v806_v48 }
 0x2d8   :  { %v716_v56 = vpop.xlane.xlu1 %715  ;;  %v722_v57 = vpop.permute.xlu0 %721  ;;  %v816_v61 = vsel %vm756_vm2, %v815_v54, %v811_v51 }
 0x2d9   :  { %v820_v59 = vrot.slane %v716_v56, %v761_v37  ;;  %vm723_vm7 = vcmp.lt.s32.totalorder %v718_v19, %v722_v57 }
 0x2db   :  { %v821_v63 = vsel %vm763_vm3, %v820_v59, %v816_v61 }
 0x2dc   :  { %v827_v2 = vsel %vm826_vm6, %v821_v63, %v825_v1 }
 0x2dd   :  { %v829_v3 = vsel %vm723_vm7, %v827_v2, -1e+30 }
 0x2de   :  { %v831_v4 = vsel %vm830_vm8, %v829_v3, -inf }
 0x2df   :  { %832 = vmax.xlane.f32.xlu1 %v831_v4 }
 0x36c   :  { %v833_v6 = vpop.xlane.xlu1 %832 }
 0x36d   :  { %v836_v7 = vadd.f32 %v835_v0, %v833_v6 }
 0x36f   :  { %v891_v8 = vmul.f32 -1.442695, %v836_v7 }
 0x371   :  { %1071 = vpow2.f32 %v891_v8 }
 0x37b   :  { %v1072_v9 = vpop.eup %1071 }
 0x37c   :  { %v840_v5 = vadd.f32 1.0, %v1072_v9 }
 0x37e   :  { %1073 = vrcp.f32 %v840_v5 }
 0x388   :  { %v1074_v12 = vpop.eup %1073 }
 0x389   :  { %v844_v13 = vsel %vm843_vm9, %v1074_v12, 1.0 }
 0x38a   :  { %850 = vrot.lane.b32.xlu1 %v844_v13, %s1181_s17  ;;  %v845_v14 = vsub.f32 0.5, %v844_v13 }
 0x38c   :  { %v846_v15 = vmul.f32 0.03, %v845_v14 }
 0x38e   :  { %v848_v17 = vmul.f32 %v847_v16, %v846_v15 }
 0x3fc   :  { %v851_v18 = vpop.permute.xlu1 %850 }
 0x3fd   :  { %v854_v19 = vsel %vm853_vm10, %v848_v17, %v851_v18 }
 0x3fe   :  { %856 = vst.msk [vmem:[%s1403_s11] sm:$0xf] %vm855_vm11, %v854_v19 }
 0x3ff   :  { %861 = vsyncpa [#allocation4], 1 }
 0x400   :  { %862 = vsyncpa [#allocation6], 1 }
 0x401   :  { %863 = vsyncpa [#allocation9], 1 }

</bundles_post_ra>
